<compile_context>
chip_gen: v5e
topology: v5e:2x2
jax: 0.10.0
libtpu: 0.0.40
codegen_flags: <defaults>
</compile_context>

<pallas_src>
import jax
import jax.numpy as jnp
from jax import lax
from jax.experimental import pallas as pl
from jax.experimental.pallas import tpu as pltpu


def _round_up(n, m):
    return ((n + m - 1) // m) * m


# Contract the trailing axes of both operands ("NT" form): A(m,k).B(n,k)->(m,n)
_NT_DIMS = (((1,), (1,)), ((), ()))


def _netc_value_kernel(x_ref, eye_ref, tgt_ref, w1_ref, b1_ref, w2_ref, b2_ref,
                       red_o_ref, red_d_eps_ref, out_ref):
    """One batch tile.

    x_ref:         (TILE_N, D) streamed input tile, native batch-major layout
    eye_ref:       (D, D)      resident identity (MXU relayout)
    tgt_ref:       (D, 1)      resident target column
    w1_ref:        (H, D)      resident layer-1 weight (PyTorch (out,in) layout)
    b1_ref:        (H, 1)      resident layer-1 bias column
    w2_ref:        (O, H)      resident layer-2 weight
    b2_ref:        (O, 1)      resident layer-2 bias column
    red_o_ref:     (1, O)      ones row  -> MXU reduction over outputs
    red_d_eps_ref: (1, D)      eps row   -> MXU reduction over inputs (x eps)
    out_ref:       (1, TILE_N) lane-dense result slab
    """
    # MXU relayout to feature-major: x^T[d, n] = sum_k I[d, k] * x[n, k].
    # Keeps every downstream temporary lane-dense without a host transpose
    # pass over x or a standalone in-kernel XLU transpose.
    x_t = lax.dot_general(eye_ref[...], x_ref[...], _NT_DIMS,
                          preferred_element_type=jnp.float32)          # (D, T)
    xc = x_t - tgt_ref[...]                                            # (D, T)

    h1 = jnp.tanh(
        jnp.dot(w1_ref[...], xc, preferred_element_type=jnp.float32)
        + b1_ref[...])                                                 # (H, T)

    out = (jnp.dot(w2_ref[...], h1, preferred_element_type=jnp.float32)
           + b2_ref[...])                                              # (O, T)

    # Fused quadratic readout + eps-weighted regulariser: both feature
    # reductions run on the (otherwise idle) MXU against resident rows.
    quad = jnp.dot(red_o_ref[...], out * out,
                   preferred_element_type=jnp.float32)                 # (1, T)
    reg = jnp.dot(red_d_eps_ref[...], xc * xc,
                  preferred_element_type=jnp.float32)                  # (1, T)
    out_ref[...] = quad + reg


def netc_value_forward(x, target, w1, b1, w2, b2, eps, *, tile_n=16384):
    """x: (N, D); target: (1, D) or (D,); w1: (H, D); b1: (H,); w2: (O, H);
    b2: (O,); eps: python float or scalar.  Returns (N, 1) float32."""
    N, D = x.shape
    H, d_chk = w1.shape
    O, h_chk = w2.shape
    assert d_chk == D and h_chk == H

    # Batch tile: lane multiple of 128, no larger than needed, and (when there
    # is enough work) small enough to give >= 2 grid steps so the "parallel"
    # batch axis can balance the two TensorCores on v7x.
    tile_n = max(128, min(tile_n, _round_up(N, 128)))
    if N > 128:
        tile_n = max(128, min(tile_n, _round_up(pl.cdiv(N, 2), 128)))
    grid = (pl.cdiv(N, tile_n),)   # partial edge block; no zero-pad pass over x

    x_f = x.astype(jnp.float32)                       # no-op for f32 inputs
    eye = jnp.eye(D, dtype=jnp.float32)
    tgt_c = jnp.reshape(target.astype(jnp.float32), (D, 1))
    w1_f = w1.astype(jnp.float32)
    b1_c = jnp.reshape(b1.astype(jnp.float32), (H, 1))
    w2_f = w2.astype(jnp.float32)
    b2_c = jnp.reshape(b2.astype(jnp.float32), (O, 1))
    red_o = jnp.ones((1, O), jnp.float32)
    red_d_eps = jnp.full((1, D), eps, dtype=jnp.float32)

    # VMEM budget: the (tile_n, D) x block lane-pads D -> 128 in VMEM (double
    # buffered) plus lane-dense f32 temporaries.  Sized to fit v7x's 64 MiB
    # physical VMEM at the default tile while overriding v5e's 16 MiB scoped
    # default.
    vmem_est = (2 * tile_n * 128 * 4            # x double buffer (lane-padded)
                + 12 * tile_n * max(D, 8) * 4   # in-kernel f32 temporaries
                + 2 * 8 * tile_n * 4            # output double buffer
                + (4 << 20))                    # params + scratch headroom
    vmem_limit = int(max(32 << 20, min(100 << 20, vmem_est)))

    cost = pl.CostEstimate(
        flops=int(2 * N * (D * D + D * H + H * O + O + D) + 4 * N * (D + O)),
        transcendentals=int(N * H),
        bytes_accessed=int(4 * (N * D + N + D * D + H * D + H + O * H + O
                                + D + O + D)),
    )

    resident = lambda i: (0, 0)
    out = pl.pallas_call(
        _netc_value_kernel,
        out_shape=jax.ShapeDtypeStruct((1, N), jnp.float32),
        grid=grid,
        in_specs=[
            pl.BlockSpec((tile_n, D), lambda i: (i, 0)),  # x tile (streamed, native layout)
            pl.BlockSpec((D, D), resident),               # identity
            pl.BlockSpec((D, 1), resident),               # target
            pl.BlockSpec((H, D), resident),               # w1
            pl.BlockSpec((H, 1), resident),               # b1
            pl.BlockSpec((O, H), resident),               # w2
            pl.BlockSpec((O, 1), resident),               # b2
            pl.BlockSpec((1, O), resident),               # ones over outputs
            pl.BlockSpec((1, D), resident),               # eps over inputs
        ],
        out_specs=pl.BlockSpec((1, tile_n), lambda i: (0, i)),
        compiler_params=pltpu.CompilerParams(
            dimension_semantics=("parallel",),
            vmem_limit_bytes=vmem_limit),
        cost_estimate=cost,
    )(x_f, eye, tgt_c, w1_f, b1_c, w2_f, b2_c, red_o, red_d_eps)

    return out.reshape(N, 1)


def netc_value_reference(x, target, w1, b1, w2, b2, eps):
    """Pure-JAX reference matching the PyTorch forward (batch-major math)."""
    xc = x - jnp.reshape(target, (1, -1))
    h1 = jnp.tanh(xc @ w1.T + jnp.reshape(b1, (1, -1)))
    out = h1 @ w2.T + jnp.reshape(b2, (1, -1))
    return (jnp.sum(out ** 2, axis=1, keepdims=True)
            + eps * jnp.sum(xc ** 2, axis=1, keepdims=True))


if __name__ == "__main__":
    # Small shapes consistent with the module: Linear(n_input, n_hidden),
    # Linear(n_hidden, n_output); target has n_input features.
    N, n_input, n_hidden, n_output = 300, 32, 32, 16
    eps = 0.001

    key = jax.random.PRNGKey(0)
    k_x, k_t, k_w1, k_b1, k_w2, k_b2 = jax.random.split(key, 6)

    x = jax.random.normal(k_x, (N, n_input), dtype=jnp.float32)
    # Synthetic deterministic stand-in for np.load('./data/target_100.npy').
    target = jax.random.normal(k_t, (1, n_input), dtype=jnp.float32)

    # PyTorch Linear stores weight as (out, in); the kernel consumes that
    # layout directly.
    w1 = jax.random.normal(k_w1, (n_hidden, n_input), dtype=jnp.float32) * 0.1
    b1 = jax.random.normal(k_b1, (n_hidden,), dtype=jnp.float32) * 0.1
    w2 = jax.random.normal(k_w2, (n_output, n_hidden), dtype=jnp.float32) * 0.1
    b2 = jax.random.normal(k_b2, (n_output,), dtype=jnp.float32) * 0.1

    y_ref = netc_value_reference(x, target, w1, b1, w2, b2, eps)

    # Multi-tile path with a partial edge block (300 rows -> 3 tiles of 128,
    # last tile only 44 valid rows).
    y_small = jax.block_until_ready(
        netc_value_forward(x, target, w1, b1, w2, b2, eps, tile_n=128))
    # Default-tile path (auto-capped to 256 so the grid still has 2 steps).
    y_default = jax.block_until_ready(
        netc_value_forward(x, target, w1, b1, w2, b2, eps))

    for y in (y_small, y_default):
        assert y.shape == (N, 1), y.shape
        # MXU f32 matmuls use multi-pass bf16 emulation under DEFAULT
        # precision; 5e-4 relative leaves headroom for that rounding while
        # still catching any layout / indexing bug.
        assert jnp.allclose(y, y_ref, rtol=5e-4, atol=1e-6), (
            float(jnp.max(jnp.abs(y - y_ref))))

    print("KERNEL_OK")
</pallas_src>

<mosaic_0001>
module attributes {stable_mosaic.version = 11 : i64} {
  func.func @_netc_value_kernel(%arg0: i32, %arg1: memref<128x32xf32, #tpu.memory_space<vmem>>, %arg2: memref<32x32xf32, #tpu.memory_space<vmem>>, %arg3: memref<32x1xf32, #tpu.memory_space<vmem>>, %arg4: memref<32x32xf32, #tpu.memory_space<vmem>>, %arg5: memref<32x1xf32, #tpu.memory_space<vmem>>, %arg6: memref<16x32xf32, #tpu.memory_space<vmem>>, %arg7: memref<16x1xf32, #tpu.memory_space<vmem>>, %arg8: memref<1x16xf32, #tpu.memory_space<vmem>>, %arg9: memref<1x32xf32, #tpu.memory_space<vmem>>, %arg10: memref<1x128xf32, #tpu.memory_space<vmem>>) attributes {dimension_semantics = [#tpu.dimension_semantics<parallel>], iteration_bounds = array<i64: 3>, scalar_prefetch = 0 : i64, scratch_operands = 0 : i64, tpu.core_type = #tpu.core_type<tc>, window_params = [{transform_indices = @transform_0, window_bounds = array<i64: 128, 32>}, {pipeline_mode = #tpu.pipeline_mode<synchronous>, transform_indices = @transform_1, window_bounds = array<i64: 32, 32>}, {pipeline_mode = #tpu.pipeline_mode<synchronous>, transform_indices = @transform_2, window_bounds = array<i64: 32, 1>}, {pipeline_mode = #tpu.pipeline_mode<synchronous>, transform_indices = @transform_3, window_bounds = array<i64: 32, 32>}, {pipeline_mode = #tpu.pipeline_mode<synchronous>, transform_indices = @transform_4, window_bounds = array<i64: 32, 1>}, {pipeline_mode = #tpu.pipeline_mode<synchronous>, transform_indices = @transform_5, window_bounds = array<i64: 16, 32>}, {pipeline_mode = #tpu.pipeline_mode<synchronous>, transform_indices = @transform_6, window_bounds = array<i64: 16, 1>}, {pipeline_mode = #tpu.pipeline_mode<synchronous>, transform_indices = @transform_7, window_bounds = array<i64: 1, 16>}, {pipeline_mode = #tpu.pipeline_mode<synchronous>, transform_indices = @transform_8, window_bounds = array<i64: 1, 32>}, {transform_indices = @transform_9, window_bounds = array<i64: 1, 128>}]} {
    %c0 = arith.constant 0 : index
    %c0_0 = arith.constant 0 : index
    %0 = vector.load %arg2[%c0, %c0_0] : memref<32x32xf32, #tpu.memory_space<vmem>>, vector<32x32xf32>
    %c0_1 = arith.constant 0 : index
    %c0_2 = arith.constant 0 : index
    %1 = vector.load %arg1[%c0_1, %c0_2] : memref<128x32xf32, #tpu.memory_space<vmem>>, vector<128x32xf32>
    %cst = arith.constant dense<0.000000e+00> : vector<32x128xf32>
    %2 = tpu.matmul %0, %1, %cst {dimension_numbers = #tpu.dot_dimension_numbers<[1], [1], [0], [0], [0, 0, 1, 0], [], []>} : vector<32x32xf32>, vector<128x32xf32>, vector<32x128xf32> -> vector<32x128xf32>
    %c0_3 = arith.constant 0 : index
    %c0_4 = arith.constant 0 : index
    %3 = vector.load %arg3[%c0_3, %c0_4] : memref<32x1xf32, #tpu.memory_space<vmem>>, vector<32x1xf32>
    %4 = vector.broadcast %3 : vector<32x1xf32> to vector<32x128xf32>
    %5 = arith.subf %2, %4 : vector<32x128xf32>
    %c0_5 = arith.constant 0 : index
    %c0_6 = arith.constant 0 : index
    %6 = vector.load %arg4[%c0_5, %c0_6] : memref<32x32xf32, #tpu.memory_space<vmem>>, vector<32x32xf32>
    %cst_7 = arith.constant dense<0.000000e+00> : vector<32x128xf32>
    %7 = tpu.matmul %6, %5, %cst_7 {dimension_numbers = #tpu.dot_dimension_numbers<[1], [0], [0], [1], [0, 0, 1, 1], [], []>} : vector<32x32xf32>, vector<32x128xf32>, vector<32x128xf32> -> vector<32x128xf32>
    %c0_8 = arith.constant 0 : index
    %c0_9 = arith.constant 0 : index
    %8 = vector.load %arg5[%c0_8, %c0_9] : memref<32x1xf32, #tpu.memory_space<vmem>>, vector<32x1xf32>
    %9 = vector.broadcast %8 : vector<32x1xf32> to vector<32x128xf32>
    %10 = arith.addf %7, %9 : vector<32x128xf32>
    %11 = math.tanh %10 : vector<32x128xf32>
    %c0_10 = arith.constant 0 : index
    %c0_11 = arith.constant 0 : index
    %12 = vector.load %arg6[%c0_10, %c0_11] : memref<16x32xf32, #tpu.memory_space<vmem>>, vector<16x32xf32>
    %cst_12 = arith.constant dense<0.000000e+00> : vector<16x128xf32>
    %13 = tpu.matmul %12, %11, %cst_12 {dimension_numbers = #tpu.dot_dimension_numbers<[1], [0], [0], [1], [0, 0, 1, 1], [], []>} : vector<16x32xf32>, vector<32x128xf32>, vector<16x128xf32> -> vector<16x128xf32>
    %c0_13 = arith.constant 0 : index
    %c0_14 = arith.constant 0 : index
    %14 = vector.load %arg7[%c0_13, %c0_14] : memref<16x1xf32, #tpu.memory_space<vmem>>, vector<16x1xf32>
    %15 = vector.broadcast %14 : vector<16x1xf32> to vector<16x128xf32>
    %16 = arith.addf %13, %15 : vector<16x128xf32>
    %c0_15 = arith.constant 0 : index
    %c0_16 = arith.constant 0 : index
    %17 = vector.load %arg8[%c0_15, %c0_16] : memref<1x16xf32, #tpu.memory_space<vmem>>, vector<1x16xf32>
    %18 = arith.mulf %16, %16 : vector<16x128xf32>
    %cst_17 = arith.constant dense<0.000000e+00> : vector<1x128xf32>
    %19 = tpu.matmul %17, %18, %cst_17 {dimension_numbers = #tpu.dot_dimension_numbers<[1], [0], [0], [1], [0, 0, 1, 1], [], []>} : vector<1x16xf32>, vector<16x128xf32>, vector<1x128xf32> -> vector<1x128xf32>
    %c0_18 = arith.constant 0 : index
    %c0_19 = arith.constant 0 : index
    %20 = vector.load %arg9[%c0_18, %c0_19] : memref<1x32xf32, #tpu.memory_space<vmem>>, vector<1x32xf32>
    %21 = arith.mulf %5, %5 : vector<32x128xf32>
    %cst_20 = arith.constant dense<0.000000e+00> : vector<1x128xf32>
    %22 = tpu.matmul %20, %21, %cst_20 {dimension_numbers = #tpu.dot_dimension_numbers<[1], [0], [0], [1], [0, 0, 1, 1], [], []>} : vector<1x32xf32>, vector<32x128xf32>, vector<1x128xf32> -> vector<1x128xf32>
    %23 = arith.addf %19, %22 : vector<1x128xf32>
    %c0_21 = arith.constant 0 : index
    %c0_22 = arith.constant 0 : index
    %24 = vector.load %arg10[%c0_21, %c0_22] : memref<1x128xf32, #tpu.memory_space<vmem>>, vector<1x128xf32>
    tpu.vector_store %arg10[%c0_21, %c0_22], %23 {strides = array<i32>} : memref<1x128xf32, #tpu.memory_space<vmem>>, vector<1x128xf32>,
    return
  }
  func.func @transform_0(%arg0: i32) -> (i32, i32) {
    %c0_i32 = arith.constant 0 : i32
    %c0_i32_0 = arith.constant 0 : i32
    return %arg0, %c0_i32 : i32, i32
  }
  func.func @transform_1(%arg0: i32) -> (i32, i32) {
    %c0_i32 = arith.constant 0 : i32
    %c0_i32_0 = arith.constant 0 : i32
    %c0_i32_1 = arith.constant 0 : i32
    return %c0_i32, %c0_i32_0 : i32, i32
  }
  func.func @transform_2(%arg0: i32) -> (i32, i32) {
    %c0_i32 = arith.constant 0 : i32
    %c0_i32_0 = arith.constant 0 : i32
    %c0_i32_1 = arith.constant 0 : i32
    return %c0_i32, %c0_i32_0 : i32, i32
  }
  func.func @transform_3(%arg0: i32) -> (i32, i32) {
    %c0_i32 = arith.constant 0 : i32
    %c0_i32_0 = arith.constant 0 : i32
    %c0_i32_1 = arith.constant 0 : i32
    return %c0_i32, %c0_i32_0 : i32, i32
  }
  func.func @transform_4(%arg0: i32) -> (i32, i32) {
    %c0_i32 = arith.constant 0 : i32
    %c0_i32_0 = arith.constant 0 : i32
    %c0_i32_1 = arith.constant 0 : i32
    return %c0_i32, %c0_i32_0 : i32, i32
  }
  func.func @transform_5(%arg0: i32) -> (i32, i32) {
    %c0_i32 = arith.constant 0 : i32
    %c0_i32_0 = arith.constant 0 : i32
    %c0_i32_1 = arith.constant 0 : i32
    return %c0_i32, %c0_i32_0 : i32, i32
  }
  func.func @transform_6(%arg0: i32) -> (i32, i32) {
    %c0_i32 = arith.constant 0 : i32
    %c0_i32_0 = arith.constant 0 : i32
    %c0_i32_1 = arith.constant 0 : i32
    return %c0_i32, %c0_i32_0 : i32, i32
  }
  func.func @transform_7(%arg0: i32) -> (i32, i32) {
    %c0_i32 = arith.constant 0 : i32
    %c0_i32_0 = arith.constant 0 : i32
    %c0_i32_1 = arith.constant 0 : i32
    return %c0_i32, %c0_i32_0 : i32, i32
  }
  func.func @transform_8(%arg0: i32) -> (i32, i32) {
    %c0_i32 = arith.constant 0 : i32
    %c0_i32_0 = arith.constant 0 : i32
    %c0_i32_1 = arith.constant 0 : i32
    return %c0_i32, %c0_i32_0 : i32, i32
  }
  func.func @transform_9(%arg0: i32) -> (i32, i32) {
    %c0_i32 = arith.constant 0 : i32
    %c0_i32_0 = arith.constant 0 : i32
    return %c0_i32, %arg0 : i32, i32
  }
}

</mosaic_0001>

<bundles_post_ra>
// kernel: tpu_custom_call.1
= control target key start
LH: loop header
LB: loop body
LE: loop exit
PB: predicated region body
PF: predicated region fallthrough
CT: control target
= control target key end

     0   :  { %14 = vsyncpa [#allocation3], 0  ;;  %s1127_s0 = inlined_call_operand.vmem [shape: f32[300,32], index: 0, kind: input, shape index: {}]   ;;  %s1128_s1 = inlined_call_operand.vmem [shape: f32[32,32], index: 1, kind: input, shape index: {}]   ;;  %s1129_s2 = inlined_call_operand.vmem [shape: f32[32,1], index: 2, kind: input, shape index: {}]   ;;  %s1130_s3 = inlined_call_operand.vmem [shape: f32[32,32], index: 3, kind: input, shape index: {}]   ;;  %s1131_s4 = inlined_call_operand.vmem [shape: f32[32,1], index: 4, kind: input, shape index: {}]   ;;  %s1132_s5 = inlined_call_operand.vmem [shape: f32[16,32], index: 5, kind: input, shape index: {}]   ;;  %s1133_s6 = inlined_call_operand.vmem [shape: f32[16,1], index: 6, kind: input, shape index: {}]   ;;  %s1134_s7 = inlined_call_operand.vmem [shape: f32[1,16], index: 7, kind: input, shape index: {}]   ;;  %s1135_s8 = inlined_call_operand.vmem [shape: f32[1,32], index: 8, kind: input, shape index: {}]   ;;  %s1136_s9 = inlined_call_operand.hbm [shape: f32[1,300], index: 9, kind: output, shape index: {}]  }
   0x1   :  { %16 = vsyncpa [#allocation3 + $0x1], 0  ;;  %s932_s30 = smov 0   ;;  %s934_s10 = smov 0  }
   0x2   :  { %s936_s11 = smov 0   ;;  %s938_s12 = smov 0  }
   0x3 LB: > { %s953_s13 = sadd.s32 4294967295, %s879_s12   ;;  %s730_s14 = sadd.s32 4294967294, %s879_s12   ;;  %s879_s12 = sphi %s938_s12, %s1142_s12   ;;  %s875_s11 = sphi %s936_s11, %s1141_s11   ;;  %s871_s10 = sphi %s934_s10, %s1140_s10   ;;  %s867_s30 = sphi %s932_s30, %s1139_s30  }
   0x4   : > { %s957_s15 = sadd.s32 1, %s879_s12   ;;  %s223_s16 = sadd.s32 1, %s875_s11 }
   0x5   : > { %s220_s17 = ssub.s32 %s879_s12, %s957_s15  ;;  %p233_p0 = scmp.ne.s32.totalorder %s875_s11, %s871_s10 }
   0x6   : > { %p221_p1 = scmp.eq.s32.totalorder %s220_s17, 0  ;;  %p234_p2 = scmp.eq.s32.totalorder %s953_s13, 2 }
   0x7   : > { %p239_p3 = scmp.ne.s32.totalorder %s871_s10, %s867_s30  ;;  %p240_p4 = scmp.eq.s32.totalorder %s730_s14, 2 }
   0x8   : > { %s968_s18 = scalar_select %p221_p1, %s875_s11, %s223_s16  }
   0x9   : > { %p970_p5 = por %p234_p2, %p233_p0  ;;  %p974_p6 = por %p240_p4, %p239_p3 }
   0xa   : > { %p733_p7 = scmp.ge.s32.totalorder %s879_s12, 1  ;;  %p299_p8 = scmp.lt.s32.totalorder %s879_s12, 4 }
   0xc   : > { %p300_p9 = pnand %p733_p7, %p299_p8 }
   0xd   : > { %s734_s21 = sshll.u32 (!%p300_p9), %s953_s13, 4  ;;  %s671_s26 = scalar_lea.hbm (!%p300_p9), %s1136_s9, %s953_s13 }
   0xe   : > { %303 = sbr.rel (%p300_p9) target bundleno = 695 (0x2b7), region = 56  ;;  %p343_p10 = scmp.lt.s32.totalorder (!%p300_p9), %s734_s21, 37 }
   0xf   : > { %s675_s29 = sshll.u32 (!%p300_p9), %s671_s26, 4  ;;  %s837_s13 = scalar_lea.hbm (!%p300_p9), %s1136_s9, 3  ;;  %s676_s29 = int_to_ptr.hbm [resolvable:$true] %s675_s29 }
  0x10   : > { %s831_s16 = sshra.s32 (!%p300_p9), %s676_s29, 4  ;;  %s832_s16 = int_to_ptr.hbm [resolvable:$true] %s831_s16 }
  0x11   : > { %s833_s17 = scalar_lea.hbm (!%p300_p9), %s832_s16, 1  ;;  %p838_p0 = scmp.lt.s32.totalorder (!%p300_p9), %s832_s16, %s1136_s9 }
  0x12   : > { %p834_p11 = scmp.ne.s32.totalorder (!%p300_p9), %s832_s16, %s833_s17  ;;  %p839_p1 = scmp.lt.s32.totalorder (!%p300_p9), %s837_s13, %s833_s17 }
  0x13   : > { %s1144_s21 = smov (!%p343_p10, %s734_s21), 37  ;;  %vm372_vm0 = vcmask 261120   ;;  %v463_v9 = vld [vmem:[%s1129_s2 + $0x8] sm:$0xff]  ;;  %v465_v10 = vld [vmem:[%s1129_s2 + $0x18] sm:$0xff]  ;;  %v881_v11 = vmov 0   ;;  %v462_v14 = vld [vmem:[%s1129_s2] sm:$0xff] }
  0x14   : > { %s735_s22 = sshll.u32 %s1144_s21, 3  ;;  %807 = vset.pattern.permute.xlu1 %v881_v11  ;;  %806 = vset.pattern.permute.xlu0 %v881_v11  ;;  %v464_v15 = vld [vmem:[%s1129_s2 + $0x10] sm:$0xff]  ;;  %v495_v18 = vld [vmem:[%s1131_s4 + $0x8] sm:$0xff]  ;;  %v565_v21 = vld [vmem:[%s1133_s6] sm:$0xff]  ;;  %vm637_vm1 = vcmask 130048   ;;  %p835_p12 = pnand %p834_p11, %p970_p5 }
  0x15   : > { %s984_s25 = scalar_lea.vmem %s1127_s0, %s735_s22  ;;  %473 = vperm.xlu1 %807, %v463_v9   ;;  %483 = vperm.xlu0 %806, %v465_v10   ;;  %v494_v22 = vld [vmem:[%s1131_s4] sm:$0xff]  ;;  %v353_v25 = vld [vmem:[%s1128_s1 + $0x8] sm:$0xff]  ;;  %v354_v26 = vld [vmem:[%s1128_s1 + $0x10] sm:$0xff]  ;;  %p840_p2 = por %p839_p1, %p838_p0 }
  0x16   : > { %v371_v0 = vld [vmem:[%s984_s25 + $0x78] sm:$0xff]  ;;  %v370_v1 = vld [vmem:[%s984_s25 + $0x70] sm:$0xff]  ;;  %v369_v2 = vld [vmem:[%s984_s25 + $0x68] sm:$0xff]  ;;  %808 = vset.pattern.permute.xlu2 %v881_v11  ;;  %p836_p13 = pneg %p835_p12 }
  0x17   : > { %736 = vmatpush.xpose.msk.msra.mxu0 %vm372_vm0, %v371_v0  ;;  %v368_v3 = vld [vmem:[%s984_s25 + $0x60] sm:$0xff]  ;;  %v367_v4 = vld [vmem:[%s984_s25 + $0x58] sm:$0xff]  ;;  %v366_v5 = vld [vmem:[%s984_s25 + $0x50] sm:$0xff] }
  0x18   : > { %v365_v6 = vld [vmem:[%s984_s25 + $0x48] sm:$0xff]  ;;  %v364_v7 = vld [vmem:[%s984_s25 + $0x40] sm:$0xff]  ;;  %v363_v8 = vld [vmem:[%s984_s25 + $0x38] sm:$0xff]  ;;  %p841_p3 = pnand %p840_p2, %p836_p13 }
  0x19   : > { %v362_v12 = vld [vmem:[%s984_s25 + $0x30] sm:$0xff]  ;;  %v361_v13 = vld [vmem:[%s984_s25 + $0x28] sm:$0xff]  ;;  %v360_v16 = vld [vmem:[%s984_s25 + $0x20] sm:$0xff] }
  0x1a   : > { %v359_v17 = vld [vmem:[%s984_s25 + $0x18] sm:$0xff]  ;;  %v358_v19 = vld [vmem:[%s984_s25 + $0x10] sm:$0xff]  ;;  %v357_v20 = vld [vmem:[%s984_s25 + $0x8] sm:$0xff] }
  0x1b   : > { %737 = vmatpush.xpose.msk.msra.mxu0 %vm372_vm0, %v370_v1  ;;  %v356_v23 = vld [vmem:[%s984_s25] sm:$0xff]  ;;  %v355_v27 = vld [vmem:[%s1128_s1 + $0x18] sm:$0xff]  ;;  %v496_v45 = vld [vmem:[%s1131_s4 + $0x10] sm:$0xff]  ;;  %s336_s25 = sand.u32 1, %s871_s10  }
  0x1c   : > { %v352_v24 = vld [vmem:[%s1128_s1] sm:$0xff]  ;;  %v497_v38 = vld [vmem:[%s1131_s4 + $0x18] sm:$0xff]  ;;  %v491_v47 = vld [vmem:[%s1130_s3 + $0x8] sm:$0xff]  ;;  %s337_s27 = scalar_lea.vmem [#allocation2], %s336_s25  ;;  %s663_s14 = scalar_lea.sflag [#allocation3], %s336_s25 }
  0x1d   : > { %468 = vperm.xlu1 %807, %v462_v14   ;;  %478 = vperm.xlu0 %806, %v464_v15   ;;  %v490_v44 = vld [vmem:[%s1130_s3] sm:$0xff]  ;;  %v566_v48 = vld [vmem:[%s1133_s6 + $0x8] sm:$0xff]  ;;  %v492_v49 = vld [vmem:[%s1130_s3 + $0x10] sm:$0xff]  ;;  %s673_s28 = sshll.u32 %s337_s27, 4  ;;  %s674_s28 = int_to_ptr.vmem [resolvable:$true] %s673_s28 }
  0x1e   : > { %515 = vperm.xlu2 %808, %v497_v38   ;;  %v493_v50 = vld [vmem:[%s1130_s3 + $0x18] sm:$0xff]  ;;  %v606_v14 = vld [vmem:[%s1134_s7] sm:$0x1] }
  0x1f   : > { %738 = vmatpush.xpose.msk.msra.mxu0 %vm372_vm0, %v369_v2  ;;  %v563_v2 = vld [vmem:[%s1132_s5] sm:$0xff] }
  0x23   : > { %739 = vmatpush.xpose.msk.msra.mxu0 %vm372_vm0, %v368_v3 }
  0x25   : > { %505 = vperm.xlu0 %806, %v495_v18   ;;  %500 = vperm.xlu1 %807, %v494_v22  }
  0x26   : > { %510 = vperm.xlu2 %808, %v496_v45  }
  0x27   : > { %740 = vmatpush.xpose.msk.msra.mxu0 %vm372_vm0, %v367_v4  ;;  %v564_v4 = vld [vmem:[%s1132_s5 + $0x8] sm:$0xff] }
  0x2b   : > { %741 = vmatpush.xpose.msk.msra.mxu0 %vm372_vm0, %v366_v5  ;;  %v609_v5 = vld [vmem:[%s1135_s8] sm:$0x1] }
  0x2d   : > { %569 = vperm.xlu0 %806, %v565_v21  }
  0x2e   : > { %574 = vperm.xlu2 %808, %v566_v48  }
  0x2f   : > { %742 = vmatpush.xpose.msk.msra.mxu0 %vm372_vm0, %v365_v6 }
  0x33   : > { %743 = vmatpush.xpose.msk.msra.mxu0 %vm372_vm0, %v364_v7 }
  0x37   : > { %744 = vmatpush.xpose.msk.msra.mxu0 %vm372_vm0, %v363_v8 }
  0x3b   : > { %745 = vmatpush.xpose.msk.msra.mxu0 %vm372_vm0, %v362_v12 }
  0x3f   : > { %746 = vmatpush.xpose.msk.msra.mxu0 %vm372_vm0, %v361_v13 }
  0x43   : > { %747 = vmatpush.xpose.msk.msra.mxu0 %vm372_vm0, %v360_v16 }
  0x47   : > { %748 = vmatpush.xpose.msk.msra.mxu0 %vm372_vm0, %v359_v17 }
  0x4b   : > { %749 = vmatpush.xpose.msk.msra.mxu0 %vm372_vm0, %v358_v19 }
  0x4f   : > { %750 = vmatpush.xpose.msk.msra.mxu0 %vm372_vm0, %v357_v20 }
  0x53   : > { %751 = vmatpush.xpose.msk.msra.mxu0 %vm372_vm0, %v356_v23 }
  0x56   : > { %752 = vmatmul.msk.f32.vlgmr.msra.gmra.mxu0 %vm372_vm0, %v352_v24 }
  0x5e   : > { %753 = vmatmul.msk.f32.gmra.mxu0 %vm372_vm0, %v353_v25 }
  0x66   : > { %754 = vmatmul.msk.f32.gmra.mxu0 %vm372_vm0, %v354_v26 }
  0x6e   : > { %755 = vmatmul.msk.f32.gmra.mxu0 %vm372_vm0, %v355_v27 }
  0x78   : > { %v516_v53 = vpop.permute.xlu2 %515 }
  0x80   : > { %v511_v55 = vpop.permute.xlu2 %510 }
  0x87   : > { %v484_v30 = vpop.permute.xlu0 %483  ;;  %v474_v31 = vpop.permute.xlu1 %473 }
  0x88   : > { %v575_v8 = vpop.permute.xlu2 %574 }
  0x8f   : > { %v479_v33 = vpop.permute.xlu0 %478  ;;  %v469_v37 = vpop.permute.xlu1 %468 }
  0x97   : > { %v506_v59 = vpop.permute.xlu0 %505  ;;  %v501_v61 = vpop.permute.xlu1 %500 }
  0x9f   : > { %v570_v7 = vpop.permute.xlu0 %569 }
  0xd3   : > { %v450_v28 = vpop.f32.mrf.mxu0 }
  0xd4   : > { %v486_v41 = vsub.f32 %v450_v28, %v469_v37 }
  0xd6   : > { %v610_v46 = vmul.f32 %v486_v41, %v486_v41 }
  0xdb   : > { %v453_v29 = vpop.f32.mrf.mxu0 }
  0xdc   : > { %v487_v39 = vsub.f32 %v453_v29, %v474_v31 }
  0xde   : > { %v611_v43 = vmul.f32 %v487_v39, %v487_v39 }
  0xe3   : > { %v456_v32 = vpop.f32.mrf.mxu0 }
  0xe4   : > { %v488_v35 = vsub.f32 %v456_v32, %v479_v33 }
  0xe6   : > { %v612_v42 = vmul.f32 %v488_v35, %v488_v35 }
  0xeb   : > { %v459_v34 = vpop.f32.mrf.mxu0 }
  0xec   : > { %v489_v36 = vsub.f32 %v459_v34, %v484_v30 }
  0xee   : > { %542 = vmatpush.msra.mxu1 %v489_v36  ;;  %v613_v40 = vmul.f32 %v489_v36, %v489_v36 }
  0xf0   : > { %543 = vmatpush.msra.mxu1 %v488_v35  ;;  %629 = vmatpush.msra.mxu3 %v613_v40 }
  0xf2   : > { %544 = vmatpush.msra.mxu1 %v487_v39  ;;  %630 = vmatpush.msra.mxu3 %v612_v42 }
  0xf4   : > { %545 = vmatpush.msra.mxu1 %v486_v41  ;;  %631 = vmatpush.msra.mxu3 %v611_v43 }
  0xf5   : > { %756 = vmatmul.msk.f32.vlgmr.msra.gmra.mxu1 %vm372_vm0, %v490_v44 }
  0xf6   : > { %632 = vmatpush.msra.mxu3 %v610_v46 }
  0xf7   : > { %762 = vmatmul.msk.f32.vlgmr.msra.gmra.mxu3 %vm372_vm0, %v609_v5 }
  0xfd   : > { %757 = vmatmul.msk.f32.gmra.mxu1 %vm372_vm0, %v491_v47 }
 0x105   : > { %758 = vmatmul.msk.f32.gmra.mxu1 %vm372_vm0, %v492_v49 }
 0x10d   : > { %759 = vmatmul.msk.f32.gmra.mxu1 %vm372_vm0, %v493_v50 }
 0x172   : > { %v547_v51 = vpop.f32.mrf.mxu1 }
 0x173   : > { %v548_v62 = vadd.f32 %v547_v51, %v501_v61 }
 0x17a   : > { %v550_v52 = vpop.f32.mrf.mxu1  ;;  %v634_v15 = vpop.f32.mrf.mxu3 }
 0x17b   : > { %v551_v60 = vadd.f32 %v550_v52, %v506_v59 }
 0x182   : > { %v553_v54 = vpop.f32.mrf.mxu1 }
 0x183   : > { %v554_v57 = vadd.f32 %v553_v54, %v511_v55 }
 0x18a   : > { %v556_v56 = vpop.f32.mrf.mxu1 }
 0x18b   : > { %v557_v58 = vadd.f32 %v556_v56, %v516_v53 }
 0x18d   : > { %809 = vtanh.f32 %v557_v58 }
 0x18e   : > { %811 = vtanh.f32 %v554_v57 }
 0x18f   : > { %813 = vtanh.f32 %v551_v60 }
 0x190   : > { %815 = vtanh.f32 %v548_v62 }
 0x193   : > { %v810_v63 = vpop.eup %809 }
 0x194   : > { %595 = vmatpush.msra.mxu2 %v810_v63  ;;  %v812_v0 = vpop.eup %811 }
 0x195   : > { %v814_v1 = vpop.eup %813 }
 0x196   : > { %596 = vmatpush.msra.mxu2 %v812_v0  ;;  %v816_v3 = vpop.eup %815 }
 0x198   : > { %597 = vmatpush.msra.mxu2 %v814_v1 }
 0x19a   : > { %598 = vmatpush.msra.mxu2 %v816_v3 }
 0x19b   : > { %760 = vmatmul.msk.f32.vlgmr.msra.gmra.mxu2 %vm372_vm0, %v563_v2 }
 0x1a3   : > { %761 = vmatmul.msk.f32.gmra.mxu2 %vm372_vm0, %v564_v4 }
 0x21e   : > { %v600_v6 = vpop.f32.mrf.mxu2 }
 0x21f   : > { %v601_v10 = vadd.f32 %v600_v6, %v570_v7 }
 0x221   : > { %v607_v13 = vmul.f32 %v601_v10, %v601_v10 }
 0x226   : > { %v603_v9 = vpop.f32.mrf.mxu2 }
 0x227   : > { %v604_v11 = vadd.f32 %v603_v9, %v575_v8 }
 0x229   : > { %v608_v12 = vmul.f32 %v604_v11, %v604_v11 }
 0x22b   : > { %655 = vmatpush.msrb.mxu3 %v608_v12 }
 0x22d   : > { %656 = vmatpush.msrb.mxu3 %v607_v13 }
 0x22e   : > { %763 = vmatmul.msk.f32.vlgmr.msrb.gmra.mxu3 %vm637_vm1, %v606_v14 }
 0x2b1   : > { %v658_v16 = vpop.f32.mrf.mxu3 }
 0x2b2   : > { %v659_v17 = vadd.f32 %v658_v16, %v634_v15 }
 0x2b4   : > { %661 = vst [vmem:[%s337_s27] sm:$0x1] %v659_v17 }
 0x2b5   : > { %844 = shalt.err (!%p841_p3)
}
 0x2b6   : > { %766 = dma.vmem_to_hbm [thread:$0]  (%p970_p5), %s674_s28, 16, %s676_s29, %s663_s14  }
 0x2b7 PF: > { %p772_p4 = scmp.ge.s32.totalorder %s879_s12, 2  ;;  %s687_s25 = sand.u32 1, %s867_s30  }
 0x2b8   : > { %s688_s26 = scalar_lea.sflag [#allocation3], %s687_s25 }
 0x2b9   : > { %p769_p7 = pnand %p772_p4, %p974_p6 }
 0x2bb   : > { %p770_p8 = pneg %p769_p7 }
 0x2bd   : > { %862 = dma.done.wait (%p770_p8), %s688_s26, 16  }
 0x2be   : > { %864 = vsyncadd (%p770_p8), %s688_s26, 4294967280  ;;  %p19_p9 = scmp.ge.s32.totalorder %s957_s15, 5   ;;  %s1139_s30 = smov %s871_s10 }
 0x2bf   : > { %s1140_s10 = smov %s875_s11  ;;  %s1141_s11 = smov %s968_s18 }
 0x2c0   : > { %s1142_s12 = smov %s957_s15  ;;  %21 = sbr.rel (!%p19_p9) target bundleno = 3 (0x3), region = 91 }
 0x2c5   :  { %693 = vsyncpa [#allocation3], 1 }
 0x2c6   :  { %695 = vsyncpa [#allocation3 + $0x1], 1 }

</bundles_post_ra>
